<compile_context>
chip_gen: v5e
topology: v5e:2x2
jax: 0.10.0
libtpu: 0.0.40
codegen_flags: <defaults>
</compile_context>

<pallas_src>
import functools

import jax
import jax.numpy as jnp
from jax.experimental import pallas as pl
from jax.experimental.pallas import tpu as pltpu


# ----------------------------------------------------------------------------
# Kernel 1: fused 1x1 conv + folded BN + LeakyReLU (NCHW, spatial on lanes).
#   x_ref: (1, Cin, TM)  w_ref: (Cout, Cin)  s_ref/b_ref: (Cout, 1)
#   o_ref: (1, Cout, TM)
# ----------------------------------------------------------------------------
def _conv1x1_bn_act_kernel(x_ref, w_ref, s_ref, b_ref, o_ref, *, leaky):
    x = x_ref[0]                                                   # (Cin, TM)
    acc = jnp.dot(w_ref[...], x, preferred_element_type=jnp.float32)
    y = acc * s_ref[...] + b_ref[...]                              # folded BN
    y = jnp.where(y > 0, y, leaky * y)                             # LeakyReLU
    o_ref[0] = y.astype(o_ref.dtype)


def conv1x1_bn_act(x, w, scale, bias, *, leaky, tm=1024):
    """x: (N, Cin, H, W), w: (Cout, Cin), scale/bias: (Cout,) -> (N, Cout, H, W)."""
    N, Cin, H, W = x.shape
    Cout = w.shape[0]
    HW = H * W
    xf = x.reshape(N, Cin, HW)

    if HW <= tm:
        tm_eff, hw_pad = HW, HW           # single full-width block (ragged ok)
    else:
        assert tm % 128 == 0
        tm_eff = tm
        hw_pad = -(-HW // tm_eff) * tm_eff
        if hw_pad != HW:                  # handle ragged spatial sizes
            xf = jnp.pad(xf, ((0, 0), (0, 0), (0, hw_pad - HW)))

    s = scale.reshape(Cout, 1).astype(jnp.float32)
    b = bias.reshape(Cout, 1).astype(jnp.float32)

    out = pl.pallas_call(
        functools.partial(_conv1x1_bn_act_kernel, leaky=leaky),
        out_shape=jax.ShapeDtypeStruct((N, Cout, hw_pad), x.dtype),
        grid_spec=pltpu.PrefetchScalarGridSpec(
            num_scalar_prefetch=0,
            grid=(N, hw_pad // tm_eff),
            in_specs=[
                pl.BlockSpec((1, Cin, tm_eff), lambda n, j: (n, 0, j)),
                pl.BlockSpec((Cout, Cin), lambda n, j: (0, 0)),
                pl.BlockSpec((Cout, 1), lambda n, j: (0, 0)),
                pl.BlockSpec((Cout, 1), lambda n, j: (0, 0)),
            ],
            out_specs=pl.BlockSpec((1, Cout, tm_eff), lambda n, j: (n, 0, j)),
        ),
        compiler_params=pltpu.CompilerParams(
            dimension_semantics=("parallel", "parallel")),
    )(xf, w, s, b)

    if hw_pad != HW:
        out = out[:, :, :HW]
    return out.reshape(N, Cout, H, W)


# ----------------------------------------------------------------------------
# Kernel 2: fused (lateral + upsampled) add + 3x3 conv (pad=1) + BN + LeakyReLU.
# The spatial axis is flattened with a 1-pixel zero ring and a (W+3)-wide halo
# so every 3x3 tap is a static slice along the lane axis -> 9 MXU matmuls.
#   x1_ref/x2_ref: (1, Cin, L_ext)  w_ref: (9, Cout, Cin)
#   s_ref/b_ref:   (Cout, 1)        o_ref: (1, Cout, L)
# ----------------------------------------------------------------------------
def _merge3x3_bn_act_kernel(x1_ref, x2_ref, w_ref, s_ref, b_ref, o_ref,
                            *, leaky, row_pitch, L):
    Cout = o_ref.shape[1]
    acc = jnp.zeros((Cout, L), jnp.float32)
    for ky in range(3):
        for kx in range(3):
            off = ky * row_pitch + kx
            xt = x1_ref[0, :, off:off + L] + x2_ref[0, :, off:off + L]
            acc = acc + jnp.dot(w_ref[ky * 3 + kx], xt,
                                preferred_element_type=jnp.float32)
    y = acc * s_ref[...] + b_ref[...]
    y = jnp.where(y > 0, y, leaky * y)
    o_ref[0] = y.astype(o_ref.dtype)


def _pad_flatten_halo(x):
    """(N,C,H,W) -> 1-ring zero pad, flatten spatial, add (W+3) halo each side."""
    N, C, H, W = x.shape
    P = W + 2
    xp = jnp.pad(x, ((0, 0), (0, 0), (1, 1), (1, 1)))
    xf = xp.reshape(N, C, (H + 2) * P)
    return jnp.pad(xf, ((0, 0), (0, 0), (P + 1, P + 1))), P


def merge_conv3x3_bn_act(x_lat, x_top, w, scale, bias, *, leaky):
    """Fused (x_lat + x_top) -> 3x3 conv (pad=1) -> folded BN -> LeakyReLU."""
    # TODO(synk): for very large feature maps, block the flat spatial axis with
    # an overlapping halo (manual DMA); at FPN sizes one level fits VMEM.
    N, Cin, H, W = x_lat.shape
    Cout = w.shape[0]
    x1e, P = _pad_flatten_halo(x_lat)
    x2e, _ = _pad_flatten_halo(x_top)
    L = (H + 2) * P
    L_ext = x1e.shape[-1]

    w9 = jnp.transpose(w, (2, 3, 0, 1)).reshape(9, Cout, Cin)
    s = scale.reshape(Cout, 1).astype(jnp.float32)
    b = bias.reshape(Cout, 1).astype(jnp.float32)

    out_flat = pl.pallas_call(
        functools.partial(_merge3x3_bn_act_kernel, leaky=leaky,
                          row_pitch=P, L=L),
        out_shape=jax.ShapeDtypeStruct((N, Cout, L), x_lat.dtype),
        grid_spec=pltpu.PrefetchScalarGridSpec(
            num_scalar_prefetch=0,
            grid=(N,),
            in_specs=[
                pl.BlockSpec((1, Cin, L_ext), lambda n: (n, 0, 0)),
                pl.BlockSpec((1, Cin, L_ext), lambda n: (n, 0, 0)),
                pl.BlockSpec((9, Cout, Cin), lambda n: (0, 0, 0)),
                pl.BlockSpec((Cout, 1), lambda n: (0, 0)),
                pl.BlockSpec((Cout, 1), lambda n: (0, 0)),
            ],
            out_specs=pl.BlockSpec((1, Cout, L), lambda n: (n, 0, 0)),
        ),
        compiler_params=pltpu.CompilerParams(
            dimension_semantics=("parallel",)),
    )(x1e, x2e, w9, s, b)

    return out_flat.reshape(N, Cout, H + 2, P)[:, :, 1:H + 1, 1:W + 1]


# ----------------------------------------------------------------------------
# Glue ops + full FPN forward
# ----------------------------------------------------------------------------
def nearest_resize(x, out_h, out_w):
    # Matches F.interpolate(mode="nearest"): src = floor(dst * src_size / dst_size)
    N, C, H, W = x.shape
    rows = (jnp.arange(out_h) * H) // out_h
    cols = (jnp.arange(out_w) * W) // out_w
    return x[:, :, rows[:, None], cols[None, :]]


def _fold_bn(gamma, beta, mean, var, eps=1e-5):
    scale = gamma / jnp.sqrt(var + eps)
    return scale, beta - mean * scale


def fpn_pallas(inputs, params, out_channels):
    leaky = 0.1 if out_channels <= 64 else 0.0

    def lateral(x, p):
        w, gamma, beta, mean, var = p
        s, b = _fold_bn(gamma, beta, mean, var)
        return conv1x1_bn_act(x, w, s, b, leaky=leaky)

    def merge(x_lat, x_top, p):
        w, gamma, beta, mean, var = p
        s, b = _fold_bn(gamma, beta, mean, var)
        return merge_conv3x3_bn_act(x_lat, x_top, w, s, b, leaky=leaky)

    o1 = lateral(inputs[0], params["output1"])
    o2 = lateral(inputs[1], params["output2"])
    o3 = lateral(inputs[2], params["output3"])
    up3 = nearest_resize(o3, o2.shape[2], o2.shape[3])
    o2 = merge(o2, up3, params["merge2"])
    up2 = nearest_resize(o2, o1.shape[2], o1.shape[3])
    o1 = merge(o1, up2, params["merge1"])
    return [o1, o2, o3]


# ----------------------------------------------------------------------------
# Pure-JAX reference (same math, no Pallas)
# ----------------------------------------------------------------------------
def _ref_bn_act(y, gamma, beta, mean, var, *, leaky, eps=1e-5):
    inv = gamma / jnp.sqrt(var + eps)
    y = (y - mean[None, :, None, None]) * inv[None, :, None, None] \
        + beta[None, :, None, None]
    return jnp.where(y > 0, y, leaky * y)


def fpn_reference(inputs, params, out_channels):
    leaky = 0.1 if out_channels <= 64 else 0.0
    hi = jax.lax.Precision.HIGHEST

    def lateral(x, p):
        w, *bn = p
        y = jnp.einsum("oc,nchw->nohw", w, x, precision=hi)
        return _ref_bn_act(y, *bn, leaky=leaky)

    def merge(x, p):
        w, *bn = p
        y = jax.lax.conv_general_dilated(
            x, w, (1, 1), ((1, 1), (1, 1)),
            dimension_numbers=("NCHW", "OIHW", "NCHW"), precision=hi)
        return _ref_bn_act(y, *bn, leaky=leaky)

    o1 = lateral(inputs[0], params["output1"])
    o2 = lateral(inputs[1], params["output2"])
    o3 = lateral(inputs[2], params["output3"])
    up3 = nearest_resize(o3, o2.shape[2], o2.shape[3])
    o2 = merge(o2 + up3, params["merge2"])
    up2 = nearest_resize(o2, o1.shape[2], o1.shape[3])
    o1 = merge(o1 + up2, params["merge1"])
    return [o1, o2, o3]


if __name__ == "__main__":
    key = jax.random.PRNGKey(0)
    N = 2
    in_channels_list = [16, 32, 64]
    out_channels = 64                 # <= 64 -> leaky = 0.1, as in the module
    spatial = [(16, 16), (8, 8), (4, 4)]

    keys = iter(jax.random.split(key, 64))

    def bn_params(c):
        return (jax.random.uniform(next(keys), (c,), minval=0.5, maxval=1.5),
                0.1 * jax.random.normal(next(keys), (c,)),
                0.1 * jax.random.normal(next(keys), (c,)),
                jax.random.uniform(next(keys), (c,), minval=0.5, maxval=1.5))

    def conv1x1_w(cin, cout):
        bound = 1.0 / (cin ** 0.5)
        return jax.random.uniform(next(keys), (cout, cin),
                                  minval=-bound, maxval=bound)

    def conv3x3_w(cin, cout):
        bound = 1.0 / ((cin * 9) ** 0.5)
        return jax.random.uniform(next(keys), (cout, cin, 3, 3),
                                  minval=-bound, maxval=bound)

    params = {
        "output1": (conv1x1_w(in_channels_list[0], out_channels),
                    *bn_params(out_channels)),
        "output2": (conv1x1_w(in_channels_list[1], out_channels),
                    *bn_params(out_channels)),
        "output3": (conv1x1_w(in_channels_list[2], out_channels),
                    *bn_params(out_channels)),
        "merge1": (conv3x3_w(out_channels, out_channels),
                   *bn_params(out_channels)),
        "merge2": (conv3x3_w(out_channels, out_channels),
                   *bn_params(out_channels)),
    }

    inputs = [
        jax.random.normal(next(keys), (N, c, h, w), dtype=jnp.float32)
        for c, (h, w) in zip(in_channels_list, spatial)
    ]

    outs = fpn_pallas(inputs, params, out_channels)
    outs = jax.block_until_ready(outs)

    refs = fpn_reference(inputs, params, out_channels)

    assert len(outs) == 3
    for o, r in zip(outs, refs):
        assert o.shape == r.shape
        err = float(jnp.max(jnp.abs(o - r)))
        assert jnp.allclose(o, r, atol=1e-4, rtol=1e-4), err

    print("KERNEL_OK")
</pallas_src>

<mosaic_0001>
module attributes {stable_mosaic.version = 11 : i64} {
  func.func @_conv1x1_bn_act_kernel(%arg0: i32, %arg1: i32, %arg2: memref<1x16x256xf32, #tpu.memory_space<vmem>>, %arg3: memref<64x16xf32, #tpu.memory_space<vmem>>, %arg4: memref<64x1xf32, #tpu.memory_space<vmem>>, %arg5: memref<64x1xf32, #tpu.memory_space<vmem>>, %arg6: memref<1x64x256xf32, #tpu.memory_space<vmem>>) attributes {dimension_semantics = [#tpu.dimension_semantics<parallel>, #tpu.dimension_semantics<parallel>], iteration_bounds = array<i64: 2, 1>, scalar_prefetch = 0 : i64, scratch_operands = 0 : i64, tpu.core_type = #tpu.core_type<tc>, window_params = [{transform_indices = @transform_0, window_bounds = array<i64: 1, 16, 256>}, {pipeline_mode = #tpu.pipeline_mode<synchronous>, transform_indices = @transform_1, window_bounds = array<i64: 64, 16>}, {pipeline_mode = #tpu.pipeline_mode<synchronous>, transform_indices = @transform_2, window_bounds = array<i64: 64, 1>}, {pipeline_mode = #tpu.pipeline_mode<synchronous>, transform_indices = @transform_3, window_bounds = array<i64: 64, 1>}, {transform_indices = @transform_4, window_bounds = array<i64: 1, 64, 256>}]} {
    %c0 = arith.constant 0 : index
    %c0_0 = arith.constant 0 : index
    %c0_1 = arith.constant 0 : index
    %0 = vector.load %arg2[%c0, %c0_0, %c0_1] : memref<1x16x256xf32, #tpu.memory_space<vmem>>, vector<1x16x256xf32>
    %1 = vector.shape_cast %0 : vector<1x16x256xf32> to vector<16x256xf32>
    %c0_2 = arith.constant 0 : index
    %c0_3 = arith.constant 0 : index
    %2 = vector.load %arg3[%c0_2, %c0_3] : memref<64x16xf32, #tpu.memory_space<vmem>>, vector<64x16xf32>
    %cst = arith.constant dense<0.000000e+00> : vector<64x256xf32>
    %3 = tpu.matmul %2, %1, %cst {dimension_numbers = #tpu.dot_dimension_numbers<[1], [0], [0], [1], [0, 0, 1, 1], [], []>} : vector<64x16xf32>, vector<16x256xf32>, vector<64x256xf32> -> vector<64x256xf32>
    %c0_4 = arith.constant 0 : index
    %c0_5 = arith.constant 0 : index
    %4 = vector.load %arg4[%c0_4, %c0_5] : memref<64x1xf32, #tpu.memory_space<vmem>>, vector<64x1xf32>
    %5 = vector.broadcast %4 : vector<64x1xf32> to vector<64x256xf32>
    %6 = arith.mulf %3, %5 : vector<64x256xf32>
    %c0_6 = arith.constant 0 : index
    %c0_7 = arith.constant 0 : index
    %7 = vector.load %arg5[%c0_6, %c0_7] : memref<64x1xf32, #tpu.memory_space<vmem>>, vector<64x1xf32>
    %8 = vector.broadcast %7 : vector<64x1xf32> to vector<64x256xf32>
    %9 = arith.addf %6, %8 : vector<64x256xf32>
    %cst_8 = arith.constant 0.000000e+00 : f32
    %10 = vector.broadcast %cst_8 : f32 to vector<64x256xf32>
    %11 = arith.cmpf ogt, %9, %10 : vector<64x256xf32>
    %cst_9 = arith.constant 1.000000e-01 : f32
    %12 = vector.broadcast %cst_9 : f32 to vector<64x256xf32>
    %13 = arith.mulf %12, %9 : vector<64x256xf32>
    %14 = arith.select %11, %9, %13 : vector<64x256xi1>, vector<64x256xf32>
    %c0_10 = arith.constant 0 : index
    %c0_11 = arith.constant 0 : index
    %c0_12 = arith.constant 0 : index
    %15 = vector.load %arg6[%c0_10, %c0_11, %c0_12] : memref<1x64x256xf32, #tpu.memory_space<vmem>>, vector<1x64x256xf32>
    %16 = vector.shape_cast %15 : vector<1x64x256xf32> to vector<64x256xf32>
    %17 = vector.shape_cast %14 : vector<64x256xf32> to vector<1x64x256xf32>
    tpu.vector_store %arg6[%c0_10, %c0_11, %c0_12], %17 {strides = array<i32>} : memref<1x64x256xf32, #tpu.memory_space<vmem>>, vector<1x64x256xf32>,
    return
  }
  func.func @transform_0(%arg0: i32, %arg1: i32) -> (i32, i32, i32) {
    %c0_i32 = arith.constant 0 : i32
    %c0_i32_0 = arith.constant 0 : i32
    return %arg0, %c0_i32, %arg1 : i32, i32, i32
  }
  func.func @transform_1(%arg0: i32, %arg1: i32) -> (i32, i32) {
    %c0_i32 = arith.constant 0 : i32
    %c0_i32_0 = arith.constant 0 : i32
    %c0_i32_1 = arith.constant 0 : i32
    return %c0_i32, %c0_i32_0 : i32, i32
  }
  func.func @transform_2(%arg0: i32, %arg1: i32) -> (i32, i32) {
    %c0_i32 = arith.constant 0 : i32
    %c0_i32_0 = arith.constant 0 : i32
    %c0_i32_1 = arith.constant 0 : i32
    return %c0_i32, %c0_i32_0 : i32, i32
  }
  func.func @transform_3(%arg0: i32, %arg1: i32) -> (i32, i32) {
    %c0_i32 = arith.constant 0 : i32
    %c0_i32_0 = arith.constant 0 : i32
    %c0_i32_1 = arith.constant 0 : i32
    return %c0_i32, %c0_i32_0 : i32, i32
  }
  func.func @transform_4(%arg0: i32, %arg1: i32) -> (i32, i32, i32) {
    %c0_i32 = arith.constant 0 : i32
    %c0_i32_0 = arith.constant 0 : i32
    return %arg0, %c0_i32, %arg1 : i32, i32, i32
  }
}

</mosaic_0001>

<bundles_post_ra>
// kernel: tpu_custom_call.1
= control target key start
LH: loop header
LB: loop body
LE: loop exit
PB: predicated region body
PF: predicated region fallthrough
CT: control target
= control target key end

     0   :  { %9 = vsyncpa [#allocation3], 0  ;;  %s1063_s0 = inlined_call_operand.vmem [shape: f32[2,16,256], index: 0, kind: input, shape index: {}]   ;;  %s1064_s1 = inlined_call_operand.vmem [shape: f32[64,16], index: 1, kind: input, shape index: {}]   ;;  %s1065_s2 = inlined_call_operand.vmem [shape: f32[64,1], index: 2, kind: input, shape index: {}]   ;;  %s1066_s3 = inlined_call_operand.vmem [shape: f32[64,1], index: 3, kind: input, shape index: {}]   ;;  %s1067_s4 = inlined_call_operand.hbm [shape: f32[2,64,256], index: 4, kind: output, shape index: {}]  }
   0x1   :  { %11 = vsyncpa [#allocation3 + $0x1], 0  ;;  %s839_s15 = smov 0   ;;  %s841_s16 = smov 0  }
   0x2   :  { %s843_s17 = smov 0   ;;  %s845_s18 = smov 0  }
   0x3   :  { %s847_s19 = smov 0   ;;  %s849_s20 = smov 0  }
   0x4 LB: > { %s635_s21 = sadd.s32 4294967295, %s809_s20   ;;  %s636_s22 = sadd.s32 4294967294, %s809_s20   ;;  %s809_s20 = sphi %s849_s20, %s17_s20   ;;  %s805_s19 = sphi %s847_s19, %s1074_s19   ;;  %s801_s18 = sphi %s845_s18, %s1073_s18   ;;  %s797_s17 = sphi %s843_s17, %s1072_s17   ;;  %s793_s16 = sphi %s841_s16, %s1071_s16   ;;  %s789_s15 = sphi %s839_s15, %s1070_s15  }
   0x5   : > { %s29_s23 = sadd.s32 1, %s805_s19  ;;  %s129_s24 = sadd.s32 1, %s797_s17 }
   0x6   : > { %p31_p0 = scmp.ge.s32.totalorder %s29_s23, 2  ;;  %p139_p1 = scmp.ne.s32.totalorder %s797_s17, %s793_s16 }
   0x7   : > { %p140_p2 = scmp.eq.s32.totalorder %s635_s21, 1  ;;  %p145_p3 = scmp.ne.s32.totalorder %s793_s16, %s789_s15 }
   0x8   : > { %s1076_s23 = smov (%p31_p0, %s29_s23), 0  ;;  %p146_p5 = scmp.eq.s32.totalorder %s636_s22, 1 }
   0x9   : > { %p879_p4 = por %p140_p2, %p139_p1  ;;  %s124_s26 = ssub.s32 %s805_s19, %s1076_s23 }
   0xa   : > { %p639_p6 = scmp.ge.s32.totalorder %s809_s20, 1  ;;  %p127_p7 = scmp.eq.s32.totalorder %s124_s26, 0 }
   0xb   : > { %p886_p8 = por %p146_p5, %p145_p3  ;;  %p186_p9 = scmp.lt.s32.totalorder %s809_s20, 3 }
   0xc   : > { %s892_s28 = scalar_select %p127_p7, %s797_s17, %s129_s24  }
   0xd   : > { %p187_p10 = pnand %p639_p6, %p186_p9 }
   0xe   : > { %p217_p11 = scmp.lt.s32.totalorder (!%p187_p10), %s801_s18, 1  ;;  %s213_s8 = sand.u32 (!%p187_p10), 1, %s793_s16  }
   0xf   : > { %190 = sbr.rel (%p187_p10) target bundleno = 198 (0xc6), region = 36  ;;  %s640_s9 = sshll.u32 (!%p187_p10), %s213_s8, 7 }
  0x10   : > { %s665_s11 = sshll.u32 (!%p187_p10), %s801_s18, 7  ;;  %s539_s22 = scalar_lea.sflag (!%p187_p10), [#allocation3], %s213_s8 }
  0x11   : > { %s552_s14 = scalar_lea.hbm (!%p187_p10), %s1067_s4, %s665_s11  ;;  %s751_s5 = scalar_lea.hbm (!%p187_p10), %s1067_s4, 256 }
  0x12   : > { %s555_s21 = sshll.u32 (!%p187_p10), %s552_s14, 4  ;;  %s556_s21 = int_to_ptr.hbm [resolvable:$true] %s555_s21 }
  0x13   : > { %s745_s24 = sshra.s32 (!%p187_p10), %s556_s21, 4  ;;  %s746_s24 = int_to_ptr.hbm [resolvable:$true] %s745_s24 }
  0x14   : > { %v348_v0 = vld [vmem:[%s1065_s2 + $0x10] sm:$0xff]  ;;  %v346_v1 = vld [vmem:[%s1065_s2] sm:$0xff]  ;;  %v811_v2 = vmov 0   ;;  %s218_s7 = scalar_select %p217_p11, %s801_s18, 1  ;;  %v349_v8 = vld [vmem:[%s1065_s2 + $0x18] sm:$0xff]  ;;  %vm239_vm0 = vcmask 130048  }
  0x15   : > { %729 = vset.pattern.permute.xlu1 %v811_v2  ;;  %728 = vset.pattern.permute.xlu0 %v811_v2  ;;  %v350_v3 = vld [vmem:[%s1065_s2 + $0x20] sm:$0xff]  ;;  %v347_v9 = vld [vmem:[%s1065_s2 + $0x8] sm:$0xff]  ;;  %v353_v13 = vld [vmem:[%s1065_s2 + $0x38] sm:$0xff]  ;;  %s747_s26 = scalar_lea.hbm %s746_s24, 128  ;;  %p752_p1 = scmp.lt.s32.totalorder %s746_s24, %s1067_s4 }
  0x16   : > { %366 = vperm.xlu1 %729, %v348_v0   ;;  %356 = vperm.xlu0 %728, %v346_v1   ;;  %s664_s10 = sshll.u32 %s218_s7, 5  ;;  %v231_v10 = vld [vmem:[%s1064_s1] sm:$0xff]  ;;  %v351_v12 = vld [vmem:[%s1065_s2 + $0x28] sm:$0xff]  ;;  %v352_v14 = vld [vmem:[%s1065_s2 + $0x30] sm:$0xff]  ;;  %p748_p12 = scmp.ne.s32.totalorder %s746_s24, %s747_s26 }
  0x17   : > { %730 = vset.pattern.permute.xlu2 %v811_v2  ;;  %s224_s13 = scalar_lea.vmem %s1063_s0, %s664_s10  ;;  %v235_v11 = vld [vmem:[%s1064_s1 + $0x20] sm:$0xff]  ;;  %v232_v15 = vld [vmem:[%s1064_s1 + $0x8] sm:$0xff]  ;;  %v412_v18 = vld [vmem:[%s1066_s3 + $0x10] sm:$0xff]  ;;  %s998_s10 = scalar_lea.vmem [#allocation2], %s640_s9 }
  0x18   : > { %376 = vperm.xlu2 %730, %v350_v3   ;;  %v229_v4 = vld [vmem:[%s224_s13 + $0x10] sm:$0xff]  ;;  %v230_v5 = vld [vmem:[%s224_s13 + $0x18] sm:$0xff]  ;;  %v227_v6 = vld [vmem:[%s224_s13] sm:$0xff]  ;;  %s553_s18 = sshll.u32 %s998_s10, 4  ;;  %p749_p13 = pnand %p748_p12, %p879_p4  ;;  %s554_s18 = int_to_ptr.vmem [resolvable:$true] %s553_s18 }
  0x19   : > { %278 = vmatpush.msra.mxu0 %v229_v4  ;;  %666 = vmatpush.msra.mxu2 %v229_v4  ;;  %v228_v7 = vld [vmem:[%s224_s13 + $0x8] sm:$0xff]  ;;  %v410_v17 = vld [vmem:[%s1066_s3] sm:$0xff]  ;;  %v233_v20 = vld [vmem:[%s1064_s1 + $0x10] sm:$0xff]  ;;  %p753_p2 = scmp.lt.s32.totalorder %s751_s5, %s747_s26 }
  0x1a   : > { %319 = vmatpush.msra.mxu1 %v230_v5  ;;  %668 = vmatpush.msra.mxu3 %v230_v5  ;;  %v236_v16 = vld [vmem:[%s1064_s1 + $0x28] sm:$0xff]  ;;  %v237_v21 = vld [vmem:[%s1064_s1 + $0x30] sm:$0xff]  ;;  %v413_v22 = vld [vmem:[%s1066_s3 + $0x18] sm:$0xff]  ;;  %p750_p0 = pneg %p749_p13 }
  0x1b   : > { %279 = vmatpush.msra.mxu0 %v227_v6  ;;  %667 = vmatpush.msra.mxu2 %v227_v6  ;;  %v411_v19 = vld [vmem:[%s1066_s3 + $0x8] sm:$0xff]  ;;  %v414_v24 = vld [vmem:[%s1066_s3 + $0x20] sm:$0xff]  ;;  %v234_v25 = vld [vmem:[%s1064_s1 + $0x18] sm:$0xff]  ;;  %p754_p3 = por %p753_p2, %p752_p1 }
  0x1c   : > { %320 = vmatpush.msra.mxu1 %v228_v7  ;;  %669 = vmatpush.msra.mxu3 %v228_v7  ;;  %v415_v23 = vld [vmem:[%s1066_s3 + $0x28] sm:$0xff]  ;;  %v238_v26 = vld [vmem:[%s1064_s1 + $0x38] sm:$0xff]  ;;  %v416_v27 = vld [vmem:[%s1066_s3 + $0x30] sm:$0xff] }
  0x1d   : > { %643 = vmatmul.msk.f32.vlgmr.msra.gmra.mxu0 %vm239_vm0, %v231_v10  ;;  %647 = vmatmul.msk.f32.vlgmr.msra.gmra.mxu2 %vm239_vm0, %v235_v11  ;;  %v417_v28 = vld [vmem:[%s1066_s3 + $0x38] sm:$0xff]  ;;  %p755_p5 = pnand %p754_p3, %p750_p0 }
  0x1e   : > { %371 = vperm.xlu1 %729, %v349_v8   ;;  %361 = vperm.xlu0 %728, %v347_v9  }
  0x1f   : > { %651 = vmatmul.msk.f32.vlgmr.msra.gmra.mxu1 %vm239_vm0, %v231_v10  ;;  %655 = vmatmul.msk.f32.vlgmr.msra.gmra.mxu3 %vm239_vm0, %v235_v11 }
  0x20   : > { %381 = vperm.xlu2 %730, %v351_v12  }
  0x25   : > { %644 = vmatmul.msk.f32.gmra.mxu0 %vm239_vm0, %v232_v15  ;;  %648 = vmatmul.msk.f32.gmra.mxu2 %vm239_vm0, %v236_v16 }
  0x26   : > { %391 = vperm.xlu1 %729, %v353_v13   ;;  %386 = vperm.xlu0 %728, %v352_v14  }
  0x27   : > { %652 = vmatmul.msk.f32.gmra.mxu1 %vm239_vm0, %v232_v15  ;;  %656 = vmatmul.msk.f32.gmra.mxu3 %vm239_vm0, %v236_v16 }
  0x28   : > { %420 = vperm.xlu2 %730, %v410_v17  }
  0x2d   : > { %645 = vmatmul.msk.f32.gmra.mxu0 %vm239_vm0, %v233_v20  ;;  %649 = vmatmul.msk.f32.gmra.mxu2 %vm239_vm0, %v237_v21 }
  0x2e   : > { %430 = vperm.xlu1 %729, %v412_v18   ;;  %425 = vperm.xlu0 %728, %v411_v19  }
  0x2f   : > { %653 = vmatmul.msk.f32.gmra.mxu1 %vm239_vm0, %v233_v20  ;;  %657 = vmatmul.msk.f32.gmra.mxu3 %vm239_vm0, %v237_v21 }
  0x30   : > { %435 = vperm.xlu2 %730, %v413_v22  }
  0x35   : > { %646 = vmatmul.msk.f32.gmra.mxu0 %vm239_vm0, %v234_v25  ;;  %650 = vmatmul.msk.f32.gmra.mxu2 %vm239_vm0, %v238_v26 }
  0x36   : > { %445 = vperm.xlu1 %729, %v415_v23   ;;  %440 = vperm.xlu0 %728, %v414_v24  }
  0x37   : > { %654 = vmatmul.msk.f32.gmra.mxu1 %vm239_vm0, %v234_v25  ;;  %658 = vmatmul.msk.f32.gmra.mxu3 %vm239_vm0, %v238_v26 }
  0x38   : > { %450 = vperm.xlu2 %730, %v416_v27  }
  0x3e   : > { %455 = vperm.xlu0 %728, %v417_v28  }
  0x72   : > { %v377_v31 = vpop.permute.xlu2 %376 }
  0x7a   : > { %v382_v34 = vpop.permute.xlu2 %381 }
  0x82   : > { %v421_v40 = vpop.permute.xlu2 %420 }
  0x88   : > { %v987_v29 = vpop.permute.xlu1 %366  ;;  %v357_v30 = vpop.permute.xlu0 %356 }
  0x8a   : > { %v436_v0 = vpop.permute.xlu2 %435 }
  0x90   : > { %v989_v32 = vpop.permute.xlu1 %371  ;;  %v362_v33 = vpop.permute.xlu0 %361 }
  0x98   : > { %v991_v35 = vpop.permute.xlu0 %386  ;;  %v993_v36 = vpop.permute.xlu1 %391 }
  0x9a   : > { %v281_v37 = vpop.f32.mrf.mxu0 }
  0x9b   : > { %v394_v38 = vmul.f32 %v357_v30, %v281_v37 }
  0x9c   : > { %v322_v39 = vpop.f32.mrf.mxu1 }
  0x9d   : > { %v395_v41 = vmul.f32 %v357_v30, %v322_v39  ;;  %v458_v42 = vadd.f32 %v421_v40, %v394_v38 }
  0x9f   : > { %v459_v43 = vadd.f32 %v421_v40, %v395_v41  ;;  %vm474_vm1 = vcmp.gt.f32.partialorder %v458_v42, 0.0  ;;  %v490_v45 = vmul.f32 0.1, %v458_v42 }
  0xa0   : > { %v426_v44 = vpop.permute.xlu0 %425  ;;  %v293_v47 = vpop.f32.mrf.mxu2 }
  0xa1   : > { %vm475_vm2 = vcmp.gt.f32.partialorder %v459_v43, 0.0  ;;  %v491_v46 = vmul.f32 0.1, %v459_v43  ;;  %v506_v48 = vsel %vm474_vm1, %v458_v42, %v490_v45  ;;  %v431_v49 = vpop.permute.xlu1 %430  ;;  %v402_v56 = vmul.f32 %v377_v31, %v293_v47 }
  0xa2   : > { %v334_v50 = vpop.f32.mrf.mxu3  ;;  %522 = vst [vmem:[%s998_s10] sm:$0xff] %v506_v48  ;;  %v284_v52 = vpop.f32.mrf.mxu0 }
  0xa3   : > { %v507_v51 = vsel %vm475_vm2, %v459_v43, %v491_v46  ;;  %v396_v53 = vmul.f32 %v362_v33, %v284_v52  ;;  %v403_v57 = vmul.f32 %v377_v31, %v334_v50  ;;  %v451_v31 = vpop.permute.xlu2 %450 }
  0xa4   : > { %523 = vst [vmem:[%s998_s10 + $0x8] sm:$0xff] %v507_v51  ;;  %v325_v54 = vpop.f32.mrf.mxu1 }
  0xa5   : > { %v397_v55 = vmul.f32 %v362_v33, %v325_v54  ;;  %v460_v58 = vadd.f32 %v426_v44, %v396_v53 }
  0xa7   : > { %v461_v59 = vadd.f32 %v426_v44, %v397_v55  ;;  %vm476_vm3 = vcmp.gt.f32.partialorder %v460_v58, 0.0  ;;  %v492_v61 = vmul.f32 0.1, %v460_v58 }
  0xa8   : > { %v441_v60 = vpop.permute.xlu0 %440  ;;  %v296_v2 = vpop.f32.mrf.mxu2 }
  0xa9   : > { %v466_v62 = vadd.f32 %v441_v60, %v402_v56  ;;  %v467_v63 = vadd.f32 %v441_v60, %v403_v57  ;;  %vm477_vm4 = vcmp.gt.f32.partialorder %v461_v59, 0.0  ;;  %v493_v1 = vmul.f32 0.1, %v461_v59  ;;  %v446_v11 = vpop.permute.xlu1 %445 }
  0xaa   : > { %v508_v3 = vsel %vm476_vm3, %v460_v58, %v492_v61  ;;  %v337_v5 = vpop.f32.mrf.mxu3  ;;  %v404_v8 = vmul.f32 %v382_v34, %v296_v2  ;;  %v287_v10 = vpop.f32.mrf.mxu0 }
  0xab   : > { %vm482_vm5 = vcmp.gt.f32.partialorder %v466_v62, 0.0  ;;  %vm483_vm6 = vcmp.gt.f32.partialorder %v467_v63, 0.0  ;;  %v498_v4 = vmul.f32 0.1, %v466_v62  ;;  %524 = vst [vmem:[%s998_s10 + $0x10] sm:$0xff] %v508_v3  ;;  %v509_v6 = vsel %vm477_vm4, %v461_v59, %v493_v1 }
  0xac   : > { %v499_v7 = vmul.f32 0.1, %v467_v63  ;;  %v405_v9 = vmul.f32 %v382_v34, %v337_v5  ;;  %525 = vst [vmem:[%s998_s10 + $0x18] sm:$0xff] %v509_v6  ;;  %v398_v13 = vmul.f32 %v987_v29, %v287_v10  ;;  %v328_v14 = vpop.f32.mrf.mxu1  ;;  %v468_v16 = vadd.f32 %v446_v11, %v404_v8 }
  0xad   : > { %v514_v12 = vsel %vm482_vm5, %v466_v62, %v498_v4  ;;  %v399_v18 = vmul.f32 %v987_v29, %v328_v14 }
  0xae   : > { %v515_v15 = vsel %vm483_vm6, %v467_v63, %v499_v7  ;;  %530 = vst [vmem:[%s998_s10 + $0x40] sm:$0xff] %v514_v12  ;;  %v469_v17 = vadd.f32 %v446_v11, %v405_v9  ;;  %v462_v19 = vadd.f32 %v431_v49, %v398_v13  ;;  %vm484_vm7 = vcmp.gt.f32.partialorder %v468_v16, 0.0 }
  0xaf   : > { %531 = vst [vmem:[%s998_s10 + $0x48] sm:$0xff] %v515_v15  ;;  %v500_v20 = vmul.f32 0.1, %v468_v16  ;;  %v463_v23 = vadd.f32 %v431_v49, %v399_v18 }
  0xb0   : > { %vm485_vm8 = vcmp.gt.f32.partialorder %v469_v17, 0.0  ;;  %v501_v21 = vmul.f32 0.1, %v469_v17  ;;  %vm478_vm9 = vcmp.gt.f32.partialorder %v462_v19, 0.0  ;;  %v494_v22 = vmul.f32 0.1, %v462_v19  ;;  %v299_v26 = vpop.f32.mrf.mxu2  ;;  %v456_v53 = vpop.permute.xlu0 %455 }
  0xb1   : > { %v516_v24 = vsel %vm484_vm7, %v468_v16, %v500_v20  ;;  %vm479_vm10 = vcmp.gt.f32.partialorder %v463_v23, 0.0  ;;  %v495_v28 = vmul.f32 0.1, %v463_v23  ;;  %v406_v29 = vmul.f32 %v991_v35, %v299_v26 }
  0xb2   : > { %v517_v25 = vsel %vm485_vm8, %v469_v17, %v501_v21  ;;  %532 = vst [vmem:[%s998_s10 + $0x50] sm:$0xff] %v516_v24  ;;  %v510_v27 = vsel %vm478_vm9, %v462_v19, %v494_v22  ;;  %v340_v30 = vpop.f32.mrf.mxu3  ;;  %v290_v34 = vpop.f32.mrf.mxu0 }
  0xb3   : > { %533 = vst [vmem:[%s998_s10 + $0x58] sm:$0xff] %v517_v25  ;;  %v407_v33 = vmul.f32 %v991_v35, %v340_v30  ;;  %v511_v37 = vsel %vm479_vm10, %v463_v23, %v495_v28  ;;  %v470_v38 = vadd.f32 %v451_v31, %v406_v29  ;;  %v400_v39 = vmul.f32 %v989_v32, %v290_v34 }
  0xb4   : > { %526 = vst [vmem:[%s998_s10 + $0x20] sm:$0xff] %v510_v27  ;;  %v331_v40 = vpop.f32.mrf.mxu1 }
  0xb5   : > { %527 = vst [vmem:[%s998_s10 + $0x28] sm:$0xff] %v511_v37  ;;  %v471_v41 = vadd.f32 %v451_v31, %v407_v33  ;;  %v401_v42 = vmul.f32 %v989_v32, %v331_v40  ;;  %vm486_vm11 = vcmp.gt.f32.partialorder %v470_v38, 0.0  ;;  %v502_v43 = vmul.f32 0.1, %v470_v38 }
  0xb6   : > { %v464_v44 = vadd.f32 %v436_v0, %v400_v39 }
  0xb7   : > { %vm487_vm12 = vcmp.gt.f32.partialorder %v471_v41, 0.0  ;;  %v503_v45 = vmul.f32 0.1, %v471_v41  ;;  %v465_v35 = vadd.f32 %v436_v0, %v401_v42  ;;  %v518_v46 = vsel %vm486_vm11, %v470_v38, %v502_v43 }
  0xb8   : > { %vm480_vm13 = vcmp.gt.f32.partialorder %v464_v44, 0.0  ;;  %v496_v47 = vmul.f32 0.1, %v464_v44  ;;  %534 = vst [vmem:[%s998_s10 + $0x60] sm:$0xff] %v518_v46  ;;  %v302_v50 = vpop.f32.mrf.mxu2 }
  0xb9   : > { %v519_v48 = vsel %vm487_vm12, %v471_v41, %v503_v45  ;;  %vm481_vm14 = vcmp.gt.f32.partialorder %v465_v35, 0.0  ;;  %v497_v49 = vmul.f32 0.1, %v465_v35  ;;  %v408_v51 = vmul.f32 %v993_v36, %v302_v50 }
  0xba   : > { %535 = vst [vmem:[%s998_s10 + $0x68] sm:$0xff] %v519_v48  ;;  %v512_v32 = vsel %vm480_vm13, %v464_v44, %v496_v47  ;;  %v343_v52 = vpop.f32.mrf.mxu3 }
  0xbb   : > { %528 = vst [vmem:[%s998_s10 + $0x30] sm:$0xff] %v512_v32  ;;  %v513_v54 = vsel %vm481_vm14, %v465_v35, %v497_v49  ;;  %v409_v55 = vmul.f32 %v993_v36, %v343_v52  ;;  %v472_v56 = vadd.f32 %v456_v53, %v408_v51 }
  0xbc   : > { %529 = vst [vmem:[%s998_s10 + $0x38] sm:$0xff] %v513_v54 }
  0xbd   : > { %v473_v57 = vadd.f32 %v456_v53, %v409_v55  ;;  %vm488_vm15 = vcmp.gt.f32.partialorder %v472_v56, 0.0  ;;  %v504_v58 = vmul.f32 0.1, %v472_v56 }
  0xbf   : > { %vm489_vm0 = vcmp.gt.f32.partialorder %v473_v57, 0.0  ;;  %v505_v59 = vmul.f32 0.1, %v473_v57  ;;  %v520_v60 = vsel %vm488_vm15, %v472_v56, %v504_v58 }
  0xc0   : > { %536 = vst [vmem:[%s998_s10 + $0x70] sm:$0xff] %v520_v60 }
  0xc1   : > { %v521_v61 = vsel %vm489_vm0, %v473_v57, %v505_v59 }
  0xc2   : > { %537 = vst [vmem:[%s998_s10 + $0x78] sm:$0xff] %v521_v61 }
  0xc3   : > { %758 = shalt.err (!%p755_p5)
}
  0xc4   : > { %s812_s8 = smov 256   ;;  %s813_s9 = smov 16  }
  0xc5   : > { %670 = dma.vmem_to_hbm [thread:$0]  (%p879_p4), %s554_s18, 2048, %s556_s21, %s539_s22, %s812_s8, %s812_s8, %s813_s9  }
  0xc6 PF: > { %p676_p6 = scmp.ge.s32.totalorder %s809_s20, 2  ;;  %s570_s10 = sand.u32 1, %s789_s15  }
  0xc7   : > { %s571_s11 = scalar_lea.sflag [#allocation3], %s570_s10 }
  0xc8   : > { %p673_p7 = pnand %p676_p6, %p886_p8 }
  0xca   : > { %p674_p9 = pneg %p673_p7 }
  0xcc   : > { %784 = dma.done.wait (%p674_p9), %s571_s11, 2048  }
  0xcd   : > { %786 = vsyncadd (%p674_p9), %s571_s11, 4294965248  ;;  %s17_s20 = sadd.s32 1, %s809_s20   ;;  %s1070_s15 = smov %s793_s16 }
  0xce   : > { %p14_p10 = scmp.ge.s32.totalorder %s17_s20, 4   ;;  %s1071_s16 = smov %s797_s17 }
  0xcf   : > { %s1072_s17 = smov %s892_s28  ;;  %s1073_s18 = smov %s805_s19 }
  0xd0   : > { %s1074_s19 = smov %s1076_s23  ;;  %16 = sbr.rel (!%p14_p10) target bundleno = 4 (0x4), region = 71 }
  0xd5   :  { %577 = vsyncpa [#allocation3], 1 }
  0xd6   :  { %579 = vsyncpa [#allocation3 + $0x1], 1 }

</bundles_post_ra>
